<compile_context>
chip_gen: v7x
topology: tpu7x:2x2x1
jax: 0.10.0
libtpu: 0.0.40
codegen_flags: <defaults>
</compile_context>

<pallas_src>
import jax
import jax.numpy as jnp
from jax import lax
from jax.experimental import pallas as pl
from jax.experimental.pallas import tpu as pltpu

# quant ranges
W_QMIN, W_QMAX = -128.0, 127.0   # signed int8, symmetric, zp = 0
A_QMIN, A_QMAX = 0.0, 255.0      # unsigned 8-bit, zp = 0 (post-ReLU)


def _round_up(a, b):
    return (a + b - 1) // b * b


def _qlinear_kernel(x_ref, wq_ref, ws_ref, b_ref, asc_ref, o_ref, acc_ref):
    """One (tm, tn) output tile, accumulated over the K grid axis.

    x_ref  : (tm, tk) bf16   activation tile
    wq_ref : (tn, tk) bf16   integer-valued fake-quantized weight tile
    ws_ref : (1, tn)  f32    per-output-channel weight scale (lane-dense)
    b_ref  : (1, tn)  f32    bias
    asc_ref: (1, 2)   f32 SMEM  [a_scale, 1/a_scale]
    o_ref  : (tm, tn) f32    output tile
    acc_ref: (tm, tn) f32    VMEM accumulator scratch
    """
    k = pl.program_id(2)

    @pl.when(k == 0)
    def _():
        acc_ref[...] = jnp.zeros_like(acc_ref)

    # MXU: contract K on both operands (no explicit transpose), bf16 in, f32 acc.
    acc_ref[...] += lax.dot_general(
        x_ref[...], wq_ref[...],
        (((1,), (1,)), ((), ())),
        preferred_element_type=jnp.float32,
    )

    @pl.when(k == pl.num_programs(2) - 1)
    def _():
        # Per-output-channel dequant scale applied post-matmul (exact), + bias.
        y = acc_ref[...] * ws_ref[...] + b_ref[...]
        # Activation: ReLU.
        y = jnp.maximum(y, 0.0)
        # Per-tensor post-activation fake-quant (multiply by 1/scale, no divide).
        a_scale = asc_ref[0, 0]
        inv_a_scale = asc_ref[0, 1]
        q = jnp.clip(jnp.round(y * inv_a_scale), A_QMIN, A_QMAX)
        o_ref[...] = (q * a_scale).astype(o_ref.dtype)


def _prep_quantized_weight(weight, w_scale):
    """One-time weight fake-quant prep (integer codes, exactly held in bf16)."""
    ws_safe = jnp.maximum(w_scale.reshape(-1, 1).astype(jnp.float32), 1e-12)
    w_int = jnp.clip(jnp.round(weight.astype(jnp.float32) / ws_safe),
                     W_QMIN, W_QMAX)
    return w_int.astype(jnp.bfloat16)   # values in [-128, 127]: exact in bf16


def quantized_layer_forward(x, weight, bias, w_scale, a_scale,
                            *, tm=128, tn=128, tk=256):
    """x: (M, K) float; weight: (N, K); bias: (N,); w_scale: (N,); a_scale: scalar."""
    M, K = x.shape
    N = weight.shape[0]

    Mp, Np, Kp = _round_up(M, tm), _round_up(N, tn), _round_up(K, tk)

    # ---- one-time prep (not the per-token hot path) ----
    w_int = _prep_quantized_weight(weight, w_scale)                  # (N, K) bf16

    x_p = jnp.zeros((Mp, Kp), jnp.bfloat16).at[:M, :K].set(x.astype(jnp.bfloat16))
    w_p = jnp.zeros((Np, Kp), jnp.bfloat16).at[:N, :K].set(w_int)
    ws_p = jnp.zeros((1, Np), jnp.float32).at[0, :N].set(w_scale.astype(jnp.float32))
    b_p = jnp.zeros((1, Np), jnp.float32).at[0, :N].set(bias.astype(jnp.float32))
    a_s = jnp.float32(a_scale)
    asc = jnp.stack([a_s, 1.0 / a_s]).reshape(1, 2)                  # SMEM scalars

    grid = (Mp // tm, Np // tn, Kp // tk)

    out_p = pl.pallas_call(
        _qlinear_kernel,
        out_shape=jax.ShapeDtypeStruct((Mp, Np), jnp.float32),
        grid_spec=pltpu.PrefetchScalarGridSpec(
            num_scalar_prefetch=0,
            grid=grid,
            in_specs=[
                pl.BlockSpec((tm, tk), lambda i, j, k: (i, k)),   # x
                pl.BlockSpec((tn, tk), lambda i, j, k: (j, k)),   # w_int (N,K)
                pl.BlockSpec((1, tn), lambda i, j, k: (0, j)),    # per-ch w scale
                pl.BlockSpec((1, tn), lambda i, j, k: (0, j)),    # bias
                pl.BlockSpec((1, 2), lambda i, j, k: (0, 0),
                             memory_space=pltpu.SMEM),            # [a_s, 1/a_s]
            ],
            out_specs=pl.BlockSpec((tm, tn), lambda i, j, k: (i, j)),
            scratch_shapes=[pltpu.VMEM((tm, tn), jnp.float32)],
        ),
        compiler_params=pltpu.CompilerParams(
            dimension_semantics=("parallel", "parallel", "arbitrary")),
    )(x_p, w_p, ws_p, b_p, asc)

    return out_p[:M, :N]


def _reference(x, weight, bias, w_scale, a_scale):
    """Matches the module semantics with the kernel's bf16-MXU numerics."""
    ws_safe = jnp.maximum(w_scale.reshape(-1, 1), 1e-12)
    w_int = jnp.clip(jnp.round(weight / ws_safe), W_QMIN, W_QMAX)
    acc = lax.dot_general(x.astype(jnp.bfloat16), w_int.astype(jnp.bfloat16),
                          (((1,), (1,)), ((), ())),
                          preferred_element_type=jnp.float32)
    y = acc * w_scale[None, :] + bias[None, :]
    y = jnp.maximum(y, 0.0)
    y = jnp.clip(jnp.round(y / a_scale), A_QMIN, A_QMAX) * a_scale
    return y


if __name__ == "__main__":
    key = jax.random.PRNGKey(0)
    k_x, k_w, k_b = jax.random.split(key, 3)

    batch, seq = 2, 8
    in_features, out_features = 256, 256
    M = batch * seq                                     # 16 rows (padded to tm)

    x = jax.random.normal(k_x, (M, in_features), jnp.float32)
    weight = jax.random.normal(k_w, (out_features, in_features), jnp.float32) * 0.1
    bias = jax.random.normal(k_b, (out_features,), jnp.float32) * 0.01

    # Deterministic "observer" results (calibration glue, not the hot path):
    # per-output-channel symmetric weight scale, fixed per-tensor act scale.
    # TODO(synk): observer calibration / LSQ scale learning has no Pallas
    # equivalent; scales are precomputed here as the module would after calib.
    w_scale = jnp.max(jnp.abs(weight), axis=1) / W_QMAX
    a_scale = jnp.float32(0.02)

    out = quantized_layer_forward(x, weight, bias, w_scale, a_scale)
    out = jax.block_until_ready(out)

    ref = _reference(x, weight, bias, w_scale, a_scale)
    assert out.shape == (M, out_features)
    diff = jnp.abs(out - ref)
    # Outputs are quantized to multiples of a_scale; allow at most a one-step
    # rounding flip at exact boundaries, and require near-exact agreement overall.
    assert float(jnp.max(diff)) <= float(a_scale) + 1e-5, "mismatch vs reference"
    assert float(jnp.mean(diff)) < 1e-3, "mismatch vs reference"

    print("KERNEL_OK")
</pallas_src>

<mosaic_0001>
module attributes {stable_mosaic.version = 11 : i64} {
  func.func @_qlinear_kernel(%arg0: i32, %arg1: i32, %arg2: i32, %arg3: memref<128x256xbf16, #tpu.memory_space<vmem>>, %arg4: memref<128x256xbf16, #tpu.memory_space<vmem>>, %arg5: memref<1x128xf32, #tpu.memory_space<vmem>>, %arg6: memref<1x128xf32, #tpu.memory_space<vmem>>, %arg7: memref<1x2xf32, #tpu.memory_space<smem>>, %arg8: memref<128x128xf32, #tpu.memory_space<vmem>>, %arg9: memref<128x128xf32, #tpu.memory_space<vmem>>) attributes {dimension_semantics = [#tpu.dimension_semantics<parallel>, #tpu.dimension_semantics<parallel>, #tpu.dimension_semantics<arbitrary>], iteration_bounds = array<i64: 1, 2, 1>, scalar_prefetch = 0 : i64, scratch_operands = 1 : i64, tpu.core_type = #tpu.core_type<tc>, window_params = [{transform_indices = @transform_0, window_bounds = array<i64: 128, 256>}, {transform_indices = @transform_1, window_bounds = array<i64: 128, 256>}, {transform_indices = @transform_2, window_bounds = array<i64: 1, 128>}, {transform_indices = @transform_3, window_bounds = array<i64: 1, 128>}, {transform_indices = @transform_4, window_bounds = array<i64: 1, 2>}, {transform_indices = @transform_5, window_bounds = array<i64: 128, 128>}]} {
    %c0_i32 = arith.constant 0 : i32
    %0 = arith.cmpi eq, %arg2, %c0_i32 : i32
    %1 = arith.extui %0 : i1 to i32
    %c0_i32_0 = arith.constant 0 : i32
    %2 = arith.cmpi ne, %1, %c0_i32_0 : i32
    scf.if %2 {
      %cst_10 = arith.constant 0.000000e+00 : f32
      %12 = vector.broadcast %cst_10 : f32 to vector<128x128xf32>
      %c0_11 = arith.constant 0 : index
      %c0_12 = arith.constant 0 : index
      %13 = vector.load %arg9[%c0_11, %c0_12] : memref<128x128xf32, #tpu.memory_space<vmem>>, vector<128x128xf32>
      tpu.vector_store %arg9[%c0_11, %c0_12], %12 {strides = array<i32>} : memref<128x128xf32, #tpu.memory_space<vmem>>, vector<128x128xf32>,
    } else {
    }
    %c0 = arith.constant 0 : index
    %c0_1 = arith.constant 0 : index
    %3 = vector.load %arg9[%c0, %c0_1] : memref<128x128xf32, #tpu.memory_space<vmem>>, vector<128x128xf32>
    %c0_2 = arith.constant 0 : index
    %c0_3 = arith.constant 0 : index
    %4 = vector.load %arg3[%c0_2, %c0_3] : memref<128x256xbf16, #tpu.memory_space<vmem>>, vector<128x256xbf16>
    %c0_4 = arith.constant 0 : index
    %c0_5 = arith.constant 0 : index
    %5 = vector.load %arg4[%c0_4, %c0_5] : memref<128x256xbf16, #tpu.memory_space<vmem>>, vector<128x256xbf16>
    %cst = arith.constant dense<0.000000e+00> : vector<128x128xf32>
    %6 = tpu.matmul %4, %5, %cst {dimension_numbers = #tpu.dot_dimension_numbers<[1], [1], [0], [0], [0, 0, 1, 0], [], []>} : vector<128x256xbf16>, vector<128x256xbf16>, vector<128x128xf32> -> vector<128x128xf32>
    %7 = arith.addf %3, %6 : vector<128x128xf32>
    %c0_6 = arith.constant 0 : index
    %c0_7 = arith.constant 0 : index
    %8 = vector.load %arg9[%c0_6, %c0_7] : memref<128x128xf32, #tpu.memory_space<vmem>>, vector<128x128xf32>
    tpu.vector_store %arg9[%c0_6, %c0_7], %7 {strides = array<i32>} : memref<128x128xf32, #tpu.memory_space<vmem>>, vector<128x128xf32>,
    %c0_i32_8 = arith.constant 0 : i32
    %9 = arith.cmpi eq, %arg2, %c0_i32_8 : i32
    %10 = arith.extui %9 : i1 to i32
    %c0_i32_9 = arith.constant 0 : i32
    %11 = arith.cmpi ne, %10, %c0_i32_9 : i32
    scf.if %11 {
      %c0_10 = arith.constant 0 : index
      %c0_11 = arith.constant 0 : index
      %12 = vector.load %arg9[%c0_10, %c0_11] : memref<128x128xf32, #tpu.memory_space<vmem>>, vector<128x128xf32>
      %c0_12 = arith.constant 0 : index
      %c0_13 = arith.constant 0 : index
      %13 = vector.load %arg5[%c0_12, %c0_13] : memref<1x128xf32, #tpu.memory_space<vmem>>, vector<1x128xf32>
      %14 = vector.broadcast %13 : vector<1x128xf32> to vector<128x128xf32>
      %15 = arith.mulf %12, %14 : vector<128x128xf32>
      %c0_14 = arith.constant 0 : index
      %c0_15 = arith.constant 0 : index
      %16 = vector.load %arg6[%c0_14, %c0_15] : memref<1x128xf32, #tpu.memory_space<vmem>>, vector<1x128xf32>
      %17 = vector.broadcast %16 : vector<1x128xf32> to vector<128x128xf32>
      %18 = arith.addf %15, %17 : vector<128x128xf32>
      %cst_16 = arith.constant 0.000000e+00 : f32
      %19 = vector.broadcast %cst_16 : f32 to vector<128x128xf32>
      %20 = arith.maximumf %18, %19 : vector<128x128xf32>
      %c0_17 = arith.constant 0 : index
      %c0_18 = arith.constant 0 : index
      %21 = memref.load %arg7[%c0_17, %c0_18] : memref<1x2xf32, #tpu.memory_space<smem>>
      %c0_19 = arith.constant 0 : index
      %c1 = arith.constant 1 : index
      %22 = memref.load %arg7[%c0_19, %c1] : memref<1x2xf32, #tpu.memory_space<smem>>
      %23 = vector.broadcast %22 : f32 to vector<128x128xf32>
      %24 = arith.mulf %20, %23 : vector<128x128xf32>
      %25 = math.roundeven %24 : vector<128x128xf32>
      %cst_20 = arith.constant 0.000000e+00 : f32
      %cst_21 = arith.constant 2.550000e+02 : f32
      %26 = vector.broadcast %cst_20 : f32 to vector<128x128xf32>
      %27 = arith.maximumf %26, %25 : vector<128x128xf32>
      %28 = vector.broadcast %cst_21 : f32 to vector<128x128xf32>
      %29 = arith.minimumf %28, %27 : vector<128x128xf32>
      %30 = vector.broadcast %21 : f32 to vector<128x128xf32>
      %31 = arith.mulf %29, %30 : vector<128x128xf32>
      %c0_22 = arith.constant 0 : index
      %c0_23 = arith.constant 0 : index
      %32 = vector.load %arg8[%c0_22, %c0_23] : memref<128x128xf32, #tpu.memory_space<vmem>>, vector<128x128xf32>
      tpu.vector_store %arg8[%c0_22, %c0_23], %31 {strides = array<i32>} : memref<128x128xf32, #tpu.memory_space<vmem>>, vector<128x128xf32>,
    } else {
    }
    return
  }
  func.func @transform_0(%arg0: i32, %arg1: i32, %arg2: i32) -> (i32, i32) {
    %c0_i32 = arith.constant 0 : i32
    return %arg0, %arg2 : i32, i32
  }
  func.func @transform_1(%arg0: i32, %arg1: i32, %arg2: i32) -> (i32, i32) {
    %c0_i32 = arith.constant 0 : i32
    return %arg1, %arg2 : i32, i32
  }
  func.func @transform_2(%arg0: i32, %arg1: i32, %arg2: i32) -> (i32, i32) {
    %c0_i32 = arith.constant 0 : i32
    %c0_i32_0 = arith.constant 0 : i32
    return %c0_i32, %arg1 : i32, i32
  }
  func.func @transform_3(%arg0: i32, %arg1: i32, %arg2: i32) -> (i32, i32) {
    %c0_i32 = arith.constant 0 : i32
    %c0_i32_0 = arith.constant 0 : i32
    return %c0_i32, %arg1 : i32, i32
  }
  func.func @transform_4(%arg0: i32, %arg1: i32, %arg2: i32) -> (i32, i32) {
    %c0_i32 = arith.constant 0 : i32
    %c0_i32_0 = arith.constant 0 : i32
    %c0_i32_1 = arith.constant 0 : i32
    return %c0_i32, %c0_i32_0 : i32, i32
  }
  func.func @transform_5(%arg0: i32, %arg1: i32, %arg2: i32) -> (i32, i32) {
    %c0_i32 = arith.constant 0 : i32
    return %arg0, %arg1 : i32, i32
  }
}

</mosaic_0001>

<bundles_post_ra>
// kernel: tpu_custom_call.1
= control target key start
LH: loop header
LB: loop body
LE: loop exit
PB: predicated region body
PF: predicated region fallthrough
CT: control target
= control target key end

     0   :  { %10 = vsyncpa [#allocation4], 0  ;;  %s1830_s0 = inlined_call_operand.hbm [shape: bf16[128,256], index: 0, kind: input, shape index: {}]   ;;  %s1831_s1 = inlined_call_operand.hbm [shape: bf16[256,256], index: 1, kind: input, shape index: {}]   ;;  %s1832_s2 = inlined_call_operand.vmem [shape: f32[1,256], index: 2, kind: input, shape index: {}]   ;;  %s1833_s3 = inlined_call_operand.vmem [shape: f32[1,256], index: 3, kind: input, shape index: {}]   ;;  %s1834_s4 = inlined_call_operand.vmem [shape: f32[1,2], index: 4, kind: input, shape index: {}]   ;;  %s1835_s5 = inlined_call_operand.hbm [shape: f32[128,256], index: 5, kind: output, shape index: {}]  }
   0x1   :  { %11 = vsyncpa [#allocation8], 0 }
   0x2   :  { %13 = vsyncpa [#allocation8 + $0x1], 0 }
   0x3   :  { %14 = vsyncpa [#allocation6], 0 }
   0x4   :  { %15 = vsyncpa [#allocation5], 0 }
   0x5   :  { %17 = vsyncpa [#allocation5 + $0x1], 0  ;;  %s1463_s18 = smov 0   ;;  %s1465_s19 = smov 0  }
   0x6   :  { %s1467_s20 = smov 0   ;;  %s1469_s21 = smov 0  }
   0x7   :  { %s1471_s22 = smov 0   ;;  %s1473_s23 = smov 0  }
   0x8 LB: > { %s1035_s24 = sadd.s32 4294967295, %s1422_s23   ;;  %s1036_s25 = sadd.s32 4294967294, %s1422_s23   ;;  %s1422_s23 = sphi %s1473_s23, %s23_s23   ;;  %s1418_s22 = sphi %s1471_s22, %s1860_s22   ;;  %s1414_s21 = sphi %s1469_s21, %s1859_s21   ;;  %s1410_s20 = sphi %s1467_s20, %s1858_s20   ;;  %s1406_s19 = sphi %s1465_s19, %s1857_s19   ;;  %s1402_s18 = sphi %s1463_s18, %s1856_s18  }
   0x9   : > { %p92_p0 = scmp.ne.s32.totalorder %s1406_s19, %s1402_s18  ;;  %p1497_p1 = scmp.eq.s32.totalorder %s1035_s24, 0 }
   0xa   : > { %p1501_p2 = scmp.eq.s32.totalorder %s1035_s24, 1  ;;  %p197_p3 = scmp.eq.s32.totalorder %s1036_s25, 1 }
   0xb   : > { %s1841_s26 = scalar_select %p1497_p1, 1, 0 }
   0xc   : > { %s1842_s27 = scalar_select %p1501_p2, 1, 0 }
   0xd   : > { %p1507_p4 = por %p1497_p1, %p92_p0  ;;  %p1037_p5 = scmp.ge.s32.totalorder %s1422_s23, 1 }
   0xe   : > { %p1512_p6 = por %p197_p3, %p92_p0  ;;  %p204_p7 = scmp.lt.s32.totalorder %s1422_s23, 3 }
   0xf   : > { %s1843_s28 = scalar_select %p1507_p4, 1, 0 }
  0x10   : > { %s1844_s29 = scalar_select %p1512_p6, 1, 0 }
  0x11   : > { %p1517_p8 = pnand %p1037_p5, %p204_p7  ;;  %s1424_s6 = smov [#allocation3]  }
  0x12   : > { %s222_s7 = sshll.u32 %s1424_s6, 4  ;;  %s236_s10 = sshll.u32 %s1834_s4, 4  ;;  %s223_s7 = int_to_ptr.vmem [resolvable:$true] %s222_s7  ;;  %s1533_s10 = int_to_ptr.vmem [resolvable:$true] %s236_s10 }
  0x13   : > { %s1845_s30 = scalar_select %p1517_p8, 1, 0 }
  0x14   : > { %p1135_p9 = pneg %p1517_p8  ;;  %s1259_s14 = scalar_lea.hbm %s1830_s0, 2048 }
  0x15   : > { %p1260_p12 = scmp.ne.s32.totalorder %s1830_s0, %s1259_s14  ;;  %p1266_p5 = scmp.lt.u32.totalorder %s1259_s14, %s1830_s0 }
  0x16   : > { %p1529_p11 = pnand %p1135_p9, %p1497_p1 }
  0x18   : > { %p1261_p13 = pneg %p1529_p11 }
  0x1a   : > { %p1262_p0 = pnand %p1261_p13, %p1260_p12 }
  0x1c   : > { %p1263_p3 = pneg %p1262_p0 }
  0x1e   : > { %p1268_p7 = pnand %p1266_p5, %p1263_p3 }
  0x20   : > { %1271 = shalt.err (!%p1268_p7)
}
  0x21   : > { %s1272_s25 = scalar_lea.vmem %s223_s7, 2048  ;;  %p1280_p4 = scmp.lt.s32.totalorder %s223_s7, %s223_s7 }
  0x22   : > { %p1273_p9 = scmp.ne.s32.totalorder %s223_s7, %s1272_s25  ;;  %p1281_p1 = scmp.lt.s32.totalorder %s1272_s25, %s1272_s25 }
  0x24   : > { %p1275_p10 = pnand %p1273_p9, %p1261_p13  ;;  %p1282_p8 = por %p1281_p1, %p1280_p4 }
  0x26   : > { %p1276_p6 = pneg %p1275_p10 }
  0x28   : > { %p1283_p2 = pnand %p1282_p8, %p1276_p6 }
  0x2a   : > { %1286 = shalt.err (!%p1283_p2)
}
  0x2b   : > { %s1840_s6 = smov 128   ;;  %s1426_s8 = smov 8  }
  0x2c   : > { %1138 = dma.hbm_to_vmem [thread:$0]  (!%p1529_p11), %s1830_s0, 2048, %s223_s7, [#allocation4], %s1840_s6, %s1840_s6, %s1426_s8  }
  0x2d   : > { %s1287_s13 = scalar_lea.vmem %s1533_s10, 16  ;;  %p1295_p4 = scmp.lt.s32.totalorder %s1533_s10, %s1533_s10 }
  0x2e   : > { %p1288_p10 = scmp.ne.s32.totalorder %s1533_s10, %s1287_s13  ;;  %p1296_p6 = scmp.lt.s32.totalorder %s1287_s13, %s1287_s13 }
  0x30   : > { %p1290_p1 = pnand %p1288_p10, %p1261_p13  ;;  %p1297_p8 = por %p1296_p6, %p1295_p4 }
  0x32   : > { %p1291_p2 = pneg %p1290_p1 }
  0x34   : > { %p1298_p12 = pnand %p1297_p8, %p1291_p2 }
  0x36   : > { %1301 = shalt.err (!%p1298_p12)
}
  0x37   : > { %s1427_s14 = smov [#allocation9]   ;;  %s38_s7 = sadd.s32 1, %s1418_s22 }
  0x38   : > { %1141 = dma.vmem_to_smem (!%p1529_p11), %s1533_s10, 16, %s1427_s14, [#allocation6]  }
  0x39   : > { %s79_s15 = sadd.s32 1, %s1410_s20  ;;  %p40_p13 = scmp.ge.s32.totalorder %s38_s7, 2 }
  0x3a   : > { %p86_p0 = scmp.ne.s32.totalorder %s1410_s20, %s1406_s19  ;;  %p87_p3 = scmp.eq.s32.totalorder %s1422_s23, 0 }
  0x3b   : > { %p1152_p5 = scmp.lt.s32.totalorder %s1422_s23, 2  ;;  %s1862_s7 = smov (%p40_p13, %s38_s7), 0 }
  0x3c   : > { %p88_p7 = por %p87_p3, %p86_p0  ;;  %p1847_p9 = scmp.ne.s32.totalorder %s1842_s27, 0 }
  0x3d   : > { %s74_s16 = ssub.s32 %s1418_s22, %s1862_s7  ;;  %s247_s17 = sand.u32 1, %s1410_s20  }
  0x3e   : > { %p1580_p10 = por %p1847_p9, %p86_p0  ;;  %p77_p1 = scmp.eq.s32.totalorder %s74_s16, 0 }
  0x3f   : > { %s1041_s10 = sshll.u32 %s247_s17, 7  ;;  %s1090_s24 = sshll.u32 %s1418_s22, 11 }
  0x40   : > { %s1589_s25 = scalar_select %p77_p1, %s1410_s20, %s79_s15  }
  0x41   : > { %s1594_s13 = scalar_lea.hbm %s1831_s1, %s1090_s24  ;;  %s251_s27 = scalar_lea.vmem [#allocation7], %s1041_s10 }
  0x42   : > { %s261_s14 = sshll.u32 %s251_s27, 4  ;;  %p1598_p11 = pnand %p1152_p5, %p88_p7  ;;  %s1602_s14 = int_to_ptr.vmem [resolvable:$true] %s261_s14 }
  0x43   : > { %s1604_s15 = scalar_lea.sflag [#allocation8], %s247_s17  ;;  %s1302_s16 = scalar_lea.hbm %s1594_s13, 2048 }
  0x44   : > { %p1303_p2 = scmp.ne.s32.totalorder %s1594_s13, %s1302_s16  ;;  %p1304_p4 = pneg %p1598_p11 }
  0x45   : > { %s1307_s9 = scalar_lea.hbm %s1831_s1, 4096  ;;  %p1308_p12 = scmp.lt.u32.totalorder %s1594_s13, %s1831_s1 }
  0x46   : > { %p1305_p6 = pnand %p1304_p4, %p1303_p2  ;;  %p1309_p13 = scmp.lt.u32.totalorder %s1307_s9, %s1302_s16 }
  0x47   : > { %p1311_p3 = scmp.lt.u32.totalorder %s1302_s16, %s1594_s13 }
  0x48   : > { %p1306_p8 = pneg %p1305_p6  ;;  %p1310_p0 = por %p1309_p13, %p1308_p12 }
  0x4a   : > { %p1312_p5 = por %p1311_p3, %p1310_p0 }
  0x4c   : > { %p1313_p7 = pnand %p1312_p5, %p1306_p8 }
  0x4e   : > { %1316 = shalt.err (!%p1313_p7)
}
  0x4f   : > { %s1317_s17 = scalar_lea.vmem %s1602_s14, 2048  ;;  %s1428_s10 = smov [#allocation7]  }
  0x50   : > { %p1318_p9 = scmp.ne.s32.totalorder %s1602_s14, %s1317_s17  ;;  %s1322_s24 = sshll.u32 %s1428_s10, 4  ;;  %s1323_s24 = int_to_ptr.vmem [resolvable:$false] %s1322_s24 }
  0x51   : > { %s1324_s12 = scalar_lea.vmem %s1323_s24, 4096  ;;  %p1325_p6 = scmp.lt.s32.totalorder %s1602_s14, %s1323_s24 }
  0x52   : > { %p1320_p1 = pnand %p1318_p9, %p1304_p4  ;;  %p1326_p12 = scmp.lt.s32.totalorder %s1324_s12, %s1317_s17 }
  0x54   : > { %p1321_p2 = pneg %p1320_p1  ;;  %p1327_p13 = por %p1326_p12, %p1325_p6 }
  0x56   : > { %p1328_p0 = pnand %p1327_p13, %p1321_p2 }
  0x58   : > { %1331 = shalt.err (!%p1328_p0)
}
  0x59   : > { %s1850_s16 = smov 128   ;;  %p1851_p4 = scmp.ne.s32.totalorder %s1845_s30, 0 }
  0x5a   : > { %1145 = dma.hbm_to_vmem [thread:$0]  (!%p1598_p11), %s1594_s13, 2048, %s1602_s14, %s1604_s15, %s1850_s16, %s1850_s16, %s1426_s8  }
  0x5b   : > { %285 = sbr.rel (%p1851_p4) target bundleno = 444 (0x1bc), region = 40  ;;  %p1852_p8 = scmp.ne.s32.totalorder (!%p1851_p4), %s1841_s26, 0 }
  0x62   : > { %1385 = dma.done.wait (%p1852_p8), [#allocation4], 2048  }
  0x63   : > { %1387 = vsyncadd (%p1852_p8), [#allocation4], 4294965248  ;;  %s1642_s9 = sand.u32 1, %s1406_s19   ;;  %p1853_p11 = scmp.ne.s32.totalorder %s1843_s28, 0 }
  0x64   : > { %s1047_s6 = sshll.u32 %s1642_s9, 7  ;;  %s292_s27 = scalar_lea.sflag [#allocation8], %s1642_s9 }
  0x65   : > { %s1648_s8 = scalar_lea.vmem [#allocation7], %s1047_s6 }
  0x66   : > { %1389 = dma.done.wait (%p1853_p11), %s292_s27, 2048  }
  0x67   : > { %1391 = vsyncadd (%p1853_p11), %s292_s27, 4294965248 }
  0x68   : > { %1393 = dma.done.wait (%p1852_p8), [#allocation6], 16  }
  0x69   : > { %1395 = vsyncadd (%p1852_p8), [#allocation6], 4294967280 }
  0x6a   : > { %304 = sfence }
  0x6b   : > { %v1211_v0 = vld [vmem:[%s1648_s8 + $0x4] ss:$8 sps:$4 sm:$0xff]   ;;  %v1213_v1 = vld [vmem:[%s1648_s8] ss:$8 sps:$4 sm:$0xff]   ;;  %v1214_v2 = vld [vmem:[%s1648_s8 + $0x14] ss:$8 sps:$4 sm:$0xff]  }
  0x6c   : > { %573 = vmatprep.subr.bf16.mxu0 %v1211_v0  ;;  %1091 = vmatprep.subr.bf16.mxu1 %v1211_v0  ;;  %v1216_v3 = vld [vmem:[%s1648_s8 + $0x10] ss:$8 sps:$4 sm:$0xff]   ;;  %v1217_v4 = vld [vmem:[%s1648_s8 + $0x24] ss:$8 sps:$4 sm:$0xff]   ;;  %v1219_v7 = vld [vmem:[%s1648_s8 + $0x20] ss:$8 sps:$4 sm:$0xff]  }
  0x6d   : > { %574 = vmatpush1.bf16.xpose.msra.mxu0 %v1213_v1  ;;  %1099 = vmatpush1.bf16.xpose.msra.mxu1 %v1213_v1  ;;  %v1237_v5 = vld [vmem:[#allocation3 + $0x4] ss:$8 sps:$4 sm:$0xff]   ;;  %v1220_v8 = vld [vmem:[%s1648_s8 + $0x34] ss:$8 sps:$4 sm:$0xff]   ;;  %v1222_v9 = vld [vmem:[%s1648_s8 + $0x30] ss:$8 sps:$4 sm:$0xff]  }
  0x6e   : > { %575 = vmatprep.subr.bf16.mxu0 %v1214_v2  ;;  %1092 = vmatprep.subr.bf16.mxu1 %v1214_v2  ;;  %v1240_v6 = vld [vmem:[#allocation3 + $0x44] ss:$8 sps:$4 sm:$0xff]   ;;  %v1225_v11 = vld [vmem:[%s1648_s8 + $0x40] ss:$8 sps:$4 sm:$0xff]   ;;  %v1226_v12 = vld [vmem:[%s1648_s8 + $0x54] ss:$8 sps:$4 sm:$0xff]  }
  0x6f   : > { %605 = vmatprep.mubr.bf16.mxu0 %v1237_v5  ;;  %637 = vmatprep.mubr.bf16.mxu1 %v1240_v6  ;;  %v1223_v10 = vld [vmem:[%s1648_s8 + $0x44] ss:$8 sps:$4 sm:$0xff]   ;;  %v1228_v13 = vld [vmem:[%s1648_s8 + $0x50] ss:$8 sps:$4 sm:$0xff]   ;;  %v1231_v15 = vld [vmem:[%s1648_s8 + $0x60] ss:$8 sps:$4 sm:$0xff]  }
  0x70   : > { %v1229_v14 = vld [vmem:[%s1648_s8 + $0x64] ss:$8 sps:$4 sm:$0xff]   ;;  %v1232_v16 = vld [vmem:[%s1648_s8 + $0x74] ss:$8 sps:$4 sm:$0xff]   ;;  %v1234_v17 = vld [vmem:[%s1648_s8 + $0x70] ss:$8 sps:$4 sm:$0xff]  }
  0x71   : > { %v1235_v18 = vld [vmem:[#allocation3] ss:$8 sps:$4 sm:$0xff]   ;;  %v1241_v20 = vld [vmem:[#allocation3 + $0x14] ss:$8 sps:$4 sm:$0xff]   ;;  %v1245_v22 = vld [vmem:[#allocation3 + $0x10] ss:$8 sps:$4 sm:$0xff]  }
  0x72   : > { %v1238_v19 = vld [vmem:[#allocation3 + $0x40] ss:$8 sps:$4 sm:$0xff]   ;;  %v1243_v21 = vld [vmem:[#allocation3 + $0x54] ss:$8 sps:$4 sm:$0xff]   ;;  %v1246_v23 = vld [vmem:[#allocation3 + $0x50] ss:$8 sps:$4 sm:$0xff]  }
  0x73   : > { %v1247_v24 = vld [vmem:[#allocation3 + $0x24] ss:$8 sps:$4 sm:$0xff]   ;;  %v1251_v26 = vld [vmem:[#allocation3 + $0x20] ss:$8 sps:$4 sm:$0xff]   ;;  %v1253_v28 = vld [vmem:[#allocation3 + $0x34] ss:$8 sps:$4 sm:$0xff]  }
  0x74   : > { %v1249_v25 = vld [vmem:[#allocation3 + $0x64] ss:$8 sps:$4 sm:$0xff]   ;;  %v1252_v27 = vld [vmem:[#allocation3 + $0x60] ss:$8 sps:$4 sm:$0xff]   ;;  %v1255_v29 = vld [vmem:[#allocation3 + $0x74] ss:$8 sps:$4 sm:$0xff]  }
  0x75   : > { %576 = vmatpush1.bf16.xpose.msra.mxu0 %v1216_v3  ;;  %1100 = vmatpush1.bf16.xpose.msra.mxu1 %v1216_v3  ;;  %v1257_v30 = vld [vmem:[#allocation3 + $0x30] ss:$8 sps:$4 sm:$0xff]   ;;  %p337_p3 = scmp.lt.s32.totalorder %s1414_s21, 1  ;;  %s1084_s14 = sld [smem:[#allocation9 + $0x1]] }
  0x76   : > { %577 = vmatprep.subr.bf16.mxu0 %v1217_v4  ;;  %1093 = vmatprep.subr.bf16.mxu1 %v1217_v4  ;;  %v1258_v31 = vld [vmem:[#allocation3 + $0x70] ss:$8 sps:$4 sm:$0xff]   ;;  %s783_s24 = sld [smem:[#allocation9]]  ;;  %s1716_s12 = scalar_lea.vmem [#allocation10], %s1047_s6 }
  0x77   : > { %s338_s26 = scalar_select %p337_p3, %s1414_s21, 1 }
  0x78   : > { %s1086_s16 = sshll.u32 %s1414_s21, 7  ;;  %s899_s6 = sshll.u32 %s1716_s12, 4  ;;  %s1775_s6 = int_to_ptr.vmem [resolvable:$true] %s899_s6 }
  0x79   : > { %s339_s13 = scalar_lea.vmem %s1832_s2, %s338_s26  ;;  %s342_s10 = scalar_lea.vmem %s1833_s3, %s338_s26 }
  0x7a   : > { %v1682_v32 = vld [vmem:[%s339_s13] ss:$0 sm:$0xff]  ;;  %s1773_s26 = scalar_lea.hbm %s1835_s5, %s1086_s16  ;;  %s884_s21 = scalar_lea.sflag [#allocation5], %s1642_s9 }
  0x7b   : > { %v1684_v34 = vld [vmem:[%s342_s10] ss:$0 sm:$0xff]  ;;  %v1692_v48 = vstv %s1084_s14  ;;  %s1332_s28 = scalar_lea.vmem %s1775_s6, 2048  ;;  %s1429_s30 = smov [#allocation10]  }
  0x7c   : > { %v1700_v1 = vstv %s783_s24  ;;  %p1333_p5 = scmp.ne.s32.totalorder %s1775_s6, %s1332_s28  ;;  %s1336_s13 = sshll.u32 %s1429_s30, 4  ;;  %s1337_s13 = int_to_ptr.vmem [resolvable:$false] %s1336_s13 }
  0x7d   : > { %578 = vmatpush1.bf16.xpose.msra.mxu0 %v1219_v7  ;;  %1101 = vmatpush1.bf16.xpose.msra.mxu1 %v1219_v7  ;;  %s1338_s14 = scalar_lea.vmem %s1337_s13, 4096  ;;  %p1339_p1 = scmp.lt.s32.totalorder %s1775_s6, %s1337_s13 }
  0x7e   : > { %579 = vmatprep.subr.bf16.mxu0 %v1220_v8  ;;  %1094 = vmatprep.subr.bf16.mxu1 %v1220_v8  ;;  %p1334_p7 = pnand %p1333_p5, %p1580_p10  ;;  %p1340_p2 = scmp.lt.s32.totalorder %s1338_s14, %s1332_s28 }
  0x80   : > { %p1335_p9 = pneg %p1334_p7  ;;  %p1341_p6 = por %p1340_p2, %p1339_p1 }
  0x82   : > { %p1342_p12 = pnand %p1341_p6, %p1335_p9 }
  0x85   : > { %580 = vmatpush1.bf16.xpose.msra.mxu0 %v1222_v9  ;;  %1102 = vmatpush1.bf16.xpose.msra.mxu1 %v1222_v9 }
  0x86   : > { %581 = vmatprep.subr.bf16.mxu0 %v1223_v10  ;;  %1095 = vmatprep.subr.bf16.mxu1 %v1223_v10 }
  0x8d   : > { %582 = vmatpush1.bf16.xpose.msra.mxu0 %v1225_v11  ;;  %1103 = vmatpush1.bf16.xpose.msra.mxu1 %v1225_v11 }
  0x8e   : > { %583 = vmatprep.subr.bf16.mxu0 %v1226_v12  ;;  %1096 = vmatprep.subr.bf16.mxu1 %v1226_v12 }
  0x95   : > { %584 = vmatpush1.bf16.xpose.msra.mxu0 %v1228_v13  ;;  %1104 = vmatpush1.bf16.xpose.msra.mxu1 %v1228_v13 }
  0x96   : > { %585 = vmatprep.subr.bf16.mxu0 %v1229_v14  ;;  %1097 = vmatprep.subr.bf16.mxu1 %v1229_v14 }
  0x9d   : > { %586 = vmatpush1.bf16.xpose.msra.mxu0 %v1231_v15  ;;  %1105 = vmatpush1.bf16.xpose.msra.mxu1 %v1231_v15 }
  0x9e   : > { %587 = vmatprep.subr.bf16.mxu0 %v1232_v16  ;;  %1098 = vmatprep.subr.bf16.mxu1 %v1232_v16 }
  0xa5   : > { %588 = vmatpush1.bf16.xpose.msra.mxu0 %v1234_v17  ;;  %1106 = vmatpush1.bf16.xpose.msra.mxu1 %v1234_v17 }
  0xac   : > { %606 = vmatmul.mubr.bf16.vlgmr.msra.gmra.mrb[0].mxu0 %v1235_v18  ;;  %638 = vmatmul.mubr.bf16.vlgmr.msra.gmra.mrb[0].mxu1 %v1238_v19 }
  0xad   : > { %613 = vmatprep.mubr.bf16.mxu0 %v1241_v20  ;;  %645 = vmatprep.mubr.bf16.mxu1 %v1243_v21 }
  0xb4   : > { %614 = vmatmul.mubr.bf16.gmra.mrb[4].mxu0 %v1245_v22  ;;  %646 = vmatmul.mubr.bf16.gmra.mrb[4].mxu1 %v1246_v23 }
  0xb5   : > { %621 = vmatprep.mubr.bf16.mxu0 %v1247_v24  ;;  %653 = vmatprep.mubr.bf16.mxu1 %v1249_v25 }
  0xbc   : > { %622 = vmatmul.mubr.bf16.gmra.mrb[8].mxu0 %v1251_v26  ;;  %654 = vmatmul.mubr.bf16.gmra.mrb[8].mxu1 %v1252_v27 }
  0xbd   : > { %629 = vmatprep.mubr.bf16.mxu0 %v1253_v28  ;;  %661 = vmatprep.mubr.bf16.mxu1 %v1255_v29 }
  0xc4   : > { %630 = vmatmul.mubr.bf16.gmra.mrb[12].mxu0 %v1257_v30  ;;  %662 = vmatmul.mubr.bf16.gmra.mrb[12].mxu1 %v1258_v31 }
 0x17f   : > { %v607_v33 = vpop.f32.mrb[0].mxu0  ;;  %v639_v35 = vpop.f32.mrb[0].mxu1 }
 0x180   : > { %v728_v36 = vmul.f32 %v1682_v32, %v607_v33  ;;  %v736_v37 = vmul.f32 %v1682_v32, %v639_v35  ;;  %v609_v38 = vpop.f32.mrb[1].mxu0  ;;  %v641_v39 = vpop.f32.mrb[1].mxu1 }
 0x181   : > { %v610_v40 = vpop.f32.mrb[2].mxu0  ;;  %v642_v41 = vpop.f32.mrb[2].mxu1 }
 0x182   : > { %v751_v42 = vadd.f32 %v1684_v34, %v728_v36  ;;  %v759_v43 = vadd.f32 %v1684_v34, %v736_v37  ;;  %v729_v44 = vmul.f32 %v1682_v32, %v610_v40  ;;  %v737_v45 = vmul.f32 %v1682_v32, %v642_v41  ;;  %v612_v46 = vpop.f32.mrb[3].mxu0  ;;  %v644_v47 = vpop.f32.mrb[3].mxu1 }
 0x184   : > { %v767_v49 = vmax.f32 %v751_v42, 0.0  ;;  %v775_v50 = vmax.f32 %v759_v43, 0.0  ;;  %v752_v51 = vadd.f32 %v1684_v34, %v729_v44  ;;  %v760_v52 = vadd.f32 %v1684_v34, %v737_v45 }
 0x186   : > { %v786_v53 = vmul.f32 %v1692_v48, %v767_v49  ;;  %v794_v54 = vmul.f32 %v1692_v48, %v775_v50  ;;  %v768_v55 = vmax.f32 %v752_v51, 0.0  ;;  %v776_v56 = vmax.f32 %v760_v52, 0.0 }
 0x187   : > { %v615_v57 = vpop.f32.mrb[4].mxu0  ;;  %v647_v58 = vpop.f32.mrb[4].mxu1 }
 0x188   : > { %v1107_v59 = vround.rtne.f32 %v786_v53  ;;  %v1115_v60 = vround.rtne.f32 %v794_v54  ;;  %v787_v61 = vmul.f32 %v1692_v48, %v768_v55  ;;  %v795_v62 = vmul.f32 %v1692_v48, %v776_v56  ;;  %v617_v63 = vpop.f32.mrb[5].mxu0  ;;  %v649_v0 = vpop.f32.mrb[5].mxu1 }
 0x189   : > { %v730_v2 = vmul.f32 %v1682_v32, %v615_v57  ;;  %v738_v3 = vmul.f32 %v1682_v32, %v647_v58  ;;  %v618_v4 = vpop.f32.mrb[6].mxu0  ;;  %v650_v5 = vpop.f32.mrb[6].mxu1 }
 0x18a   : > { %v818_v6 = vmax.f32 %v1107_v59, 0.0  ;;  %v826_v7 = vmax.f32 %v1115_v60, 0.0  ;;  %v1108_v8 = vround.rtne.f32 %v787_v61  ;;  %v1116_v9 = vround.rtne.f32 %v795_v62  ;;  %v620_v10 = vpop.f32.mrb[7].mxu0  ;;  %v652_v11 = vpop.f32.mrb[7].mxu1 }
 0x18b   : > { %v753_v12 = vadd.f32 %v1684_v34, %v730_v2  ;;  %v761_v13 = vadd.f32 %v1684_v34, %v738_v3  ;;  %v731_v14 = vmul.f32 %v1682_v32, %v618_v4  ;;  %v739_v15 = vmul.f32 %v1682_v32, %v650_v5 }
 0x18c   : > { %v834_v16 = vmin.f32 %v818_v6, 255.0  ;;  %v842_v17 = vmin.f32 %v826_v7, 255.0  ;;  %v819_v18 = vmax.f32 %v1108_v8, 0.0  ;;  %v827_v19 = vmax.f32 %v1116_v9, 0.0 }
 0x18d   : > { %v769_v20 = vmax.f32 %v753_v12, 0.0  ;;  %v777_v21 = vmax.f32 %v761_v13, 0.0  ;;  %v754_v22 = vadd.f32 %v1684_v34, %v731_v14  ;;  %v762_v23 = vadd.f32 %v1684_v34, %v739_v15 }
 0x18e   : > { %v851_v24 = vmul.f32 %v1700_v1, %v834_v16  ;;  %v859_v25 = vmul.f32 %v1700_v1, %v842_v17  ;;  %v835_v26 = vmin.f32 %v819_v18, 255.0  ;;  %v843_v27 = vmin.f32 %v827_v19, 255.0 }
 0x18f   : > { %v788_v28 = vmul.f32 %v1692_v48, %v769_v20  ;;  %v796_v29 = vmul.f32 %v1692_v48, %v777_v21  ;;  %v770_v30 = vmax.f32 %v754_v22, 0.0  ;;  %v778_v31 = vmax.f32 %v762_v23, 0.0  ;;  %v623_v33 = vpop.f32.mrb[8].mxu0  ;;  %v655_v35 = vpop.f32.mrb[8].mxu1 }
 0x190   : > { %867 = vst [vmem:[%s1716_s12] sm:$0xff] %v851_v24  ;;  %875 = vst [vmem:[%s1716_s12 + $0x40] sm:$0xff] %v859_v25  ;;  %v852_v36 = vmul.f32 %v1700_v1, %v835_v26  ;;  %v860_v37 = vmul.f32 %v1700_v1, %v843_v27  ;;  %v732_v38 = vmul.f32 %v1682_v32, %v623_v33  ;;  %v625_v40 = vpop.f32.mrb[9].mxu0  ;;  %v657_v41 = vpop.f32.mrb[9].mxu1 }
 0x191   : > { %v740_v39 = vmul.f32 %v1682_v32, %v655_v35  ;;  %v1109_v42 = vround.rtne.f32 %v788_v28  ;;  %v1117_v43 = vround.rtne.f32 %v796_v29  ;;  %v789_v44 = vmul.f32 %v1692_v48, %v770_v30  ;;  %v626_v46 = vpop.f32.mrb[10].mxu0  ;;  %v658_v47 = vpop.f32.mrb[10].mxu1 }
 0x192   : > { %v797_v45 = vmul.f32 %v1692_v48, %v778_v31  ;;  %868 = vst [vmem:[%s1716_s12 + $0x8] sm:$0xff] %v852_v36  ;;  %876 = vst [vmem:[%s1716_s12 + $0x48] sm:$0xff] %v860_v37  ;;  %v755_v49 = vadd.f32 %v1684_v34, %v732_v38  ;;  %v733_v51 = vmul.f32 %v1682_v32, %v626_v46  ;;  %v628_v53 = vpop.f32.mrb[11].mxu0  ;;  %v660_v54 = vpop.f32.mrb[11].mxu1 }
 0x193   : > { %v763_v50 = vadd.f32 %v1684_v34, %v740_v39  ;;  %v741_v52 = vmul.f32 %v1682_v32, %v658_v47  ;;  %v820_v55 = vmax.f32 %v1109_v42, 0.0  ;;  %v828_v56 = vmax.f32 %v1117_v43, 0.0 }
 0x194   : > { %v1110_v57 = vround.rtne.f32 %v789_v44  ;;  %v1118_v58 = vround.rtne.f32 %v797_v45  ;;  %v771_v59 = vmax.f32 %v755_v49, 0.0  ;;  %v756_v61 = vadd.f32 %v1684_v34, %v733_v51 }
 0x195   : > { %v779_v60 = vmax.f32 %v763_v50, 0.0  ;;  %v764_v62 = vadd.f32 %v1684_v34, %v741_v52  ;;  %v836_v63 = vmin.f32 %v820_v55, 255.0  ;;  %v844_v0 = vmin.f32 %v828_v56, 255.0 }
 0x196   : > { %v821_v2 = vmax.f32 %v1110_v57, 0.0  ;;  %v829_v3 = vmax.f32 %v1118_v58, 0.0  ;;  %v790_v4 = vmul.f32 %v1692_v48, %v771_v59  ;;  %v772_v6 = vmax.f32 %v756_v61, 0.0 }
 0x197   : > { %v798_v5 = vmul.f32 %v1692_v48, %v779_v60  ;;  %v780_v7 = vmax.f32 %v764_v62, 0.0  ;;  %v853_v8 = vmul.f32 %v1700_v1, %v836_v63  ;;  %v861_v9 = vmul.f32 %v1700_v1, %v844_v0  ;;  %v631_v12 = vpop.f32.mrb[12].mxu0  ;;  %v663_v13 = vpop.f32.mrb[12].mxu1 }
 0x198   : > { %v837_v10 = vmin.f32 %v821_v2, 255.0  ;;  %v845_v11 = vmin.f32 %v829_v3, 255.0  ;;  %v1111_v14 = vround.rtne.f32 %v790_v4  ;;  %v791_v16 = vmul.f32 %v1692_v48, %v772_v6  ;;  %v633_v18 = vpop.f32.mrb[13].mxu0  ;;  %v665_v19 = vpop.f32.mrb[13].mxu1 }
 0x199   : > { %v1119_v15 = vround.rtne.f32 %v798_v5  ;;  %v799_v17 = vmul.f32 %v1692_v48, %v780_v7  ;;  %869 = vst [vmem:[%s1716_s12 + $0x10] sm:$0xff] %v853_v8  ;;  %877 = vst [vmem:[%s1716_s12 + $0x50] sm:$0xff] %v861_v9  ;;  %v734_v22 = vmul.f32 %v1682_v32, %v631_v12  ;;  %v742_v23 = vmul.f32 %v1682_v32, %v663_v13  ;;  %v634_v24 = vpop.f32.mrb[14].mxu0  ;;  %v666_v25 = vpop.f32.mrb[14].mxu1 }
 0x19a   : > { %v854_v20 = vmul.f32 %v1700_v1, %v837_v10  ;;  %v862_v21 = vmul.f32 %v1700_v1, %v845_v11  ;;  %v822_v26 = vmax.f32 %v1111_v14, 0.0  ;;  %v1112_v28 = vround.rtne.f32 %v791_v16  ;;  %v636_v30 = vpop.f32.mrb[15].mxu0  ;;  %v668_v31 = vpop.f32.mrb[15].mxu1 }
 0x19b   : > { %v830_v27 = vmax.f32 %v1119_v15, 0.0  ;;  %v1120_v29 = vround.rtne.f32 %v799_v17  ;;  %v757_v33 = vadd.f32 %v1684_v34, %v734_v22  ;;  %v765_v35 = vadd.f32 %v1684_v34, %v742_v23 }
 0x19c   : > { %870 = vst [vmem:[%s1716_s12 + $0x18] sm:$0xff] %v854_v20  ;;  %878 = vst [vmem:[%s1716_s12 + $0x58] sm:$0xff] %v862_v21  ;;  %v735_v36 = vmul.f32 %v1682_v32, %v634_v24  ;;  %v743_v37 = vmul.f32 %v1682_v32, %v666_v25  ;;  %v838_v38 = vmin.f32 %v822_v26, 255.0  ;;  %v823_v40 = vmax.f32 %v1112_v28, 0.0 }
 0x19d   : > { %v846_v39 = vmin.f32 %v830_v27, 255.0  ;;  %v831_v41 = vmax.f32 %v1120_v29, 0.0  ;;  %v773_v42 = vmax.f32 %v757_v33, 0.0  ;;  %v781_v43 = vmax.f32 %v765_v35, 0.0 }
 0x19e   : > { %v758_v44 = vadd.f32 %v1684_v34, %v735_v36  ;;  %v766_v45 = vadd.f32 %v1684_v34, %v743_v37  ;;  %v855_v46 = vmul.f32 %v1700_v1, %v838_v38  ;;  %v839_v49 = vmin.f32 %v823_v40, 255.0 }
 0x19f   : > { %v863_v47 = vmul.f32 %v1700_v1, %v846_v39  ;;  %v847_v32 = vmin.f32 %v831_v41, 255.0  ;;  %v792_v50 = vmul.f32 %v1692_v48, %v773_v42  ;;  %v800_v51 = vmul.f32 %v1692_v48, %v781_v43 }
 0x1a0   : > { %v774_v52 = vmax.f32 %v758_v44, 0.0  ;;  %v782_v53 = vmax.f32 %v766_v45, 0.0  ;;  %871 = vst [vmem:[%s1716_s12 + $0x20] sm:$0xff] %v855_v46  ;;  %v856_v54 = vmul.f32 %v1700_v1, %v839_v49 }
 0x1a1   : > { %879 = vst [vmem:[%s1716_s12 + $0x60] sm:$0xff] %v863_v47  ;;  %v864_v34 = vmul.f32 %v1700_v1, %v847_v32  ;;  %v1113_v55 = vround.rtne.f32 %v792_v50  ;;  %v1121_v56 = vround.rtne.f32 %v800_v51 }
 0x1a2   : > { %v793_v57 = vmul.f32 %v1692_v48, %v774_v52  ;;  %v801_v58 = vmul.f32 %v1692_v48, %v782_v53  ;;  %872 = vst [vmem:[%s1716_s12 + $0x28] sm:$0xff] %v856_v54 }
 0x1a3   : > { %880 = vst [vmem:[%s1716_s12 + $0x68] sm:$0xff] %v864_v34  ;;  %v824_v59 = vmax.f32 %v1113_v55, 0.0  ;;  %v832_v60 = vmax.f32 %v1121_v56, 0.0 }
 0x1a4   : > { %v1114_v61 = vround.rtne.f32 %v793_v57  ;;  %v1122_v62 = vround.rtne.f32 %v801_v58 }
 0x1a5   : > { %v840_v63 = vmin.f32 %v824_v59, 255.0  ;;  %v848_v0 = vmin.f32 %v832_v60, 255.0 }
 0x1a6   : > { %v825_v2 = vmax.f32 %v1114_v61, 0.0  ;;  %v833_v3 = vmax.f32 %v1122_v62, 0.0 }
 0x1a7   : > { %v857_v48 = vmul.f32 %v1700_v1, %v840_v63  ;;  %v865_v4 = vmul.f32 %v1700_v1, %v848_v0 }
 0x1a8   : > { %v841_v5 = vmin.f32 %v825_v2, 255.0  ;;  %v849_v6 = vmin.f32 %v833_v3, 255.0 }
 0x1a9   : > { %873 = vst [vmem:[%s1716_s12 + $0x30] sm:$0xff] %v857_v48  ;;  %881 = vst [vmem:[%s1716_s12 + $0x70] sm:$0xff] %v865_v4 }
 0x1aa   : > { %v858_v7 = vmul.f32 %v1700_v1, %v841_v5  ;;  %v866_v8 = vmul.f32 %v1700_v1, %v849_v6 }
 0x1ac   : > { %874 = vst [vmem:[%s1716_s12 + $0x38] sm:$0xff] %v858_v7  ;;  %882 = vst [vmem:[%s1716_s12 + $0x78] sm:$0xff] %v866_v8 }
 0x1ad   : > { %1345 = shalt.err (!%p1342_p12)
}
 0x1ae   : > { %s1346_s15 = scalar_lea.hbm %s1773_s26, 2048  ;;  %s1350_s24 = scalar_lea.hbm %s1835_s5, 4096 }
 0x1af   : > { %p1347_p13 = scmp.ne.s32.totalorder %s1773_s26, %s1346_s15  ;;  %p1351_p8 = scmp.lt.u32.totalorder %s1773_s26, %s1835_s5 }
 0x1b0   : > { %p1352_p11 = scmp.lt.u32.totalorder %s1350_s24, %s1346_s15  ;;  %p1354_p5 = scmp.lt.u32.totalorder %s1346_s15, %s1773_s26 }
 0x1b1   : > { %p1348_p0 = pnand %p1347_p13, %p1580_p10 }
 0x1b2   : > { %p1353_p3 = por %p1352_p11, %p1351_p8 }
 0x1b3   : > { %p1349_p4 = pneg %p1348_p0 }
 0x1b4   : > { %p1355_p7 = por %p1354_p5, %p1353_p3 }
 0x1b6   : > { %p1356_p9 = pnand %p1355_p7, %p1349_p4 }
 0x1b8   : > { %1359 = shalt.err (!%p1356_p9)
}
 0x1b9   : > { %s1430_s27 = smov 128   ;;  %s1431_s8 = smov 256  }
 0x1ba   : > { %s1432_s28 = smov 8  }
 0x1bb   : > { %1133 = dma.vmem_to_hbm [thread:$0]  (%p1580_p10), %s1775_s6, 2048, %s1773_s26, %s884_s21, %s1430_s27, %s1431_s8, %s1432_s28  }
 0x1bc PF: > { %s914_s30 = sand.u32 1, %s1402_s18   ;;  %p1854_p1 = scmp.ne.s32.totalorder %s1844_s29, 0 }
 0x1bd   : > { %p1855_p2 = scmp.ge.s32.totalorder %s1422_s23, 2  ;;  %s915_s13 = scalar_lea.sflag [#allocation5], %s914_s30 }
 0x1bf   : > { %p1147_p6 = pnand %p1855_p2, %p1854_p1 }
 0x1c1   : > { %1397 = dma.done.wait (!%p1147_p6), %s915_s13, 2048  }
 0x1c2   : > { %1399 = vsyncadd (!%p1147_p6), %s915_s13, 4294965248  ;;  %s23_s23 = sadd.s32 1, %s1422_s23   ;;  %s1856_s18 = smov %s1406_s19 }
 0x1c3   : > { %p20_p12 = scmp.ge.s32.totalorder %s23_s23, 4   ;;  %s1857_s19 = smov %s1410_s20 }
 0x1c4   : > { %s1858_s20 = smov %s1589_s25  ;;  %s1859_s21 = smov %s1418_s22 }
 0x1c5   : > { %s1860_s22 = smov %s1862_s7  ;;  %22 = sbr.rel (!%p20_p12) target bundleno = 8 (0x8), region = 110 }
 0x1cc   :  { %920 = vsyncpa [#allocation4], 1 }
 0x1cd   :  { %922 = vsyncpa [#allocation4 + $0x1], 1 }
 0x1ce   :  { %923 = vsyncpa [#allocation8], 1 }
 0x1cf   :  { %925 = vsyncpa [#allocation8 + $0x1], 1 }
 0x1d0   :  { %926 = vsyncpa [#allocation5], 1 }
 0x1d1   :  { %928 = vsyncpa [#allocation5 + $0x1], 1 }
 0x1d2   :  { %929 = vsyncpa [#allocation6], 1 }
 0x1d3   :  { %931 = vsyncpa [#allocation6 + $0x1], 1 }

</bundles_post_ra>
